<compile_context>
chip_gen: v7x
topology: tpu7x:2x2x1
jax: 0.10.0
libtpu: 0.0.40
codegen_flags: <defaults>
</compile_context>

<pallas_src>
import functools

import jax
import jax.numpy as jnp
from jax.experimental import pallas as pl
from jax.experimental.pallas import tpu as pltpu


_DEFAULT_TILE_N = 8192        # rows per grid step (lane-axis width); sweepable
_MIN_PALLAS_ROWS = 128        # below this, plain XLA beats any kernel launch


def mean_level_kernel(x_ref, w1_ref, b1_ref, w2_ref, b2_ref, o_ref):
    # x_ref : (2, T)   VMEM   -- samples on the 128-lane axis (dense vregs)
    # w1_ref: (2, 3)   SMEM   b1_ref: (3,)  SMEM
    # w2_ref: (3, C)   SMEM   b2_ref: (C,)  SMEM
    # o_ref : (C, T)   VMEM
    tile_n = x_ref.shape[1]
    n_hidden = w1_ref.shape[1]          # 3
    n_out = w2_ref.shape[1]             # C

    x0 = x_ref[0:1, :]                  # (1, T)
    x1 = x_ref[1:2, :]                  # (1, T)

    # GLOBAL sample index of each lane; only the very first sample (global
    # column 0, i.e. lane 0 of grid step 0) skips the tanh.
    lane = jax.lax.broadcasted_iota(jnp.int32, (1, tile_n), 1)
    global_col = pl.program_id(0) * tile_n + lane
    keep_linear = global_col == 0       # (1, T) bool

    # Hidden Linear(2, 3): scalar-broadcast VPU FMAs (weights from SMEM),
    # tanh on the EUP, masked only for the single global sample 0.
    h = []
    for j in range(n_hidden):
        hj = w1_ref[0, j] * x0 + w1_ref[1, j] * x1 + b1_ref[j]
        hj = jnp.where(keep_linear, hj, jnp.tanh(hj))
        h.append(hj)                    # each (1, T)

    # Output Linear(3, C): same scalar-broadcast FMA trick; assemble the
    # (C, T) slab and store it as one dense, full-lane write.
    out_rows = []
    for c in range(n_out):
        oc = (h[0] * w2_ref[0, c]
              + h[1] * w2_ref[1, c]
              + h[2] * w2_ref[2, c]
              + b2_ref[c])
        out_rows.append(oc)
    o_ref[...] = jnp.concatenate(out_rows, axis=0)


def _reference_2d(x, w1, b1, w2, b2):
    """Pure-JAX forward on an already-squeezed (N, 2) input."""
    h = x @ w1 + b1
    h = jnp.concatenate([h[0:1], jnp.tanh(h[1:])], axis=0)
    return h @ w2 + b2


def mean_level_forward(x, w1, b1, w2, b2, *,
                       tile_n=_DEFAULT_TILE_N,
                       min_pallas_rows=_MIN_PALLAS_ROWS):
    """x: (1, N, 2) or (N, 2); w1 (2,3), b1 (3,), w2 (3,C), b2 (C,); returns (N, C)."""
    if x.ndim == 3:                     # torch .squeeze(0)
        x = x[0]
    x = x.astype(jnp.float32)
    n_rows = x.shape[0]
    n_comp = w2.shape[1]

    # Tiny inputs: the pallas_call fixed overhead dwarfs the work; let XLA fuse.
    if n_rows < min_pallas_rows:
        return _reference_2d(x, w1, b1, w2, b2)

    assert tile_n % 128 == 0, "tile_n must be a multiple of the 128-lane width"
    n_tiles = pl.cdiv(n_rows, tile_n)
    n_pad = n_tiles * tile_n

    # Lane-dense layout: samples on the last (lane) axis.
    xt = x.T                            # (2, N)
    if n_pad != n_rows:
        xt = jnp.pad(xt, ((0, 0), (0, n_pad - n_rows)))

    out_t = pl.pallas_call(
        mean_level_kernel,
        out_shape=jax.ShapeDtypeStruct((n_comp, n_pad), jnp.float32),
        grid=(n_tiles,),
        in_specs=[
            pl.BlockSpec((2, tile_n), lambda i: (0, i)),
            pl.BlockSpec(memory_space=pltpu.MemorySpace.SMEM),   # w1 (2,3)
            pl.BlockSpec(memory_space=pltpu.MemorySpace.SMEM),   # b1 (3,)
            pl.BlockSpec(memory_space=pltpu.MemorySpace.SMEM),   # w2 (3,C)
            pl.BlockSpec(memory_space=pltpu.MemorySpace.SMEM),   # b2 (C,)
        ],
        out_specs=pl.BlockSpec((n_comp, tile_n), lambda i: (0, i)),
        compiler_params=pltpu.CompilerParams(
            dimension_semantics=("parallel",),          # shard rows across TCs (v7x)
            vmem_limit_bytes=32 * 1024 * 1024,          # tiles are tiny; plenty of headroom
        ),
    )(xt, w1, b1, w2, b2)

    return out_t[:, :n_rows].T          # (N, C)


def init_params(key, n_components):
    """Deterministic init matching the module's shapes.
    hidden: Linear(2, 3) -> w1 (2, 3), b1 (3,)
    output: Linear(3, C) -> w2 (3, C), b2 (C,)
    (PyTorch stores weight as (out, in); we keep the transposed (in, out) form.)
    """
    k1, k2, k3, k4 = jax.random.split(key, 4)
    lim1 = 1.0 / jnp.sqrt(2.0)
    lim2 = 1.0 / jnp.sqrt(3.0)
    w1 = jax.random.uniform(k1, (2, 3), jnp.float32, -lim1, lim1)
    b1 = jax.random.uniform(k2, (3,), jnp.float32, -lim1, lim1)
    w2 = jax.random.uniform(k3, (3, n_components), jnp.float32, -lim2, lim2)
    b2 = jax.random.uniform(k4, (n_components,), jnp.float32, -lim2, lim2)
    return w1, b1, w2, b2


def reference_forward(x, w1, b1, w2, b2):
    """Pure-JAX reference of the PyTorch forward (handles the (1, N, 2) input)."""
    if x.ndim == 3:
        x = x[0]
    return _reference_2d(x.astype(jnp.float32), w1, b1, w2, b2)


# TODO(synk): start_pretrain/stop_pretrain gradient hooks and init_weight are
# training-time parameter plumbing with no forward-pass equivalent; not ported.


if __name__ == "__main__":
    key = jax.random.PRNGKey(0)
    kx, kp = jax.random.split(key)

    n_components = 4
    N = 1000        # small demo size, but multi-tile: tile_n=256 -> 4 grid steps,
                    # padded to 1024, exercising the global-row-0 branch and padding.
    x = jax.random.normal(kx, (1, N, 2), jnp.float32)   # torch-style leading batch

    w1, b1, w2, b2 = init_params(kp, n_components)

    out = mean_level_forward(x, w1, b1, w2, b2, tile_n=256, min_pallas_rows=128)
    out = jax.block_until_ready(out)

    ref = reference_forward(x, w1, b1, w2, b2)
    assert out.shape == (N, n_components)
    assert jnp.allclose(out, ref, atol=1e-5, rtol=1e-5), "mismatch vs reference"

    print("KERNEL_OK")
</pallas_src>

<mosaic_0001>
module attributes {stable_mosaic.version = 11 : i64} {
  func.func @mean_level_kernel(%arg0: i32, %arg1: memref<2x256xf32, #tpu.memory_space<vmem>>, %arg2: memref<2x3xf32, #tpu.memory_space<smem>>, %arg3: memref<3xf32, #tpu.memory_space<smem>>, %arg4: memref<3x4xf32, #tpu.memory_space<smem>>, %arg5: memref<4xf32, #tpu.memory_space<smem>>, %arg6: memref<4x256xf32, #tpu.memory_space<vmem>>) attributes {dimension_semantics = [#tpu.dimension_semantics<parallel>], iteration_bounds = array<i64: 4>, scalar_prefetch = 0 : i64, scratch_operands = 0 : i64, tpu.core_type = #tpu.core_type<tc>, window_params = [{transform_indices = @transform_0, window_bounds = array<i64: 2, 256>}, {transform_indices = @transform_1, window_bounds = array<i64: 2, 3>}, {transform_indices = @transform_2, window_bounds = array<i64: 3>}, {transform_indices = @transform_3, window_bounds = array<i64: 3, 4>}, {transform_indices = @transform_4, window_bounds = array<i64: 4>}, {transform_indices = @transform_5, window_bounds = array<i64: 4, 256>}]} {
    %c0 = arith.constant 0 : index
    %c0_0 = arith.constant 0 : index
    %0 = vector.load %arg1[%c0, %c0_0] : memref<2x256xf32, #tpu.memory_space<vmem>>, vector<1x256xf32>
    %c1 = arith.constant 1 : index
    %c0_1 = arith.constant 0 : index
    %1 = vector.load %arg1[%c1, %c0_1] : memref<2x256xf32, #tpu.memory_space<vmem>>, vector<1x256xf32>
    %2 = tpu.iota {dimensions = array<i32: 1>} : vector<1x256xi32>
    %c256_i32 = arith.constant 256 : i32
    %3 = arith.muli %arg0, %c256_i32 : i32
    %4 = vector.broadcast %3 : i32 to vector<1x256xi32>
    %5 = arith.addi %4, %2 : vector<1x256xi32>
    %c0_i32 = arith.constant 0 : i32
    %6 = vector.broadcast %c0_i32 : i32 to vector<1x256xi32>
    %7 = arith.cmpi eq, %5, %6 : vector<1x256xi32>
    %c0_2 = arith.constant 0 : index
    %c0_3 = arith.constant 0 : index
    %8 = memref.load %arg2[%c0_2, %c0_3] : memref<2x3xf32, #tpu.memory_space<smem>>
    %9 = vector.broadcast %8 : f32 to vector<1x256xf32>
    %10 = arith.mulf %9, %0 : vector<1x256xf32>
    %c1_4 = arith.constant 1 : index
    %c0_5 = arith.constant 0 : index
    %11 = memref.load %arg2[%c1_4, %c0_5] : memref<2x3xf32, #tpu.memory_space<smem>>
    %12 = vector.broadcast %11 : f32 to vector<1x256xf32>
    %13 = arith.mulf %12, %1 : vector<1x256xf32>
    %14 = arith.addf %10, %13 : vector<1x256xf32>
    %c0_6 = arith.constant 0 : index
    %15 = memref.load %arg3[%c0_6] : memref<3xf32, #tpu.memory_space<smem>>
    %16 = vector.broadcast %15 : f32 to vector<1x256xf32>
    %17 = arith.addf %14, %16 : vector<1x256xf32>
    %18 = math.tanh %17 : vector<1x256xf32>
    %19 = arith.select %7, %17, %18 : vector<1x256xi1>, vector<1x256xf32>
    %c0_7 = arith.constant 0 : index
    %c1_8 = arith.constant 1 : index
    %20 = memref.load %arg2[%c0_7, %c1_8] : memref<2x3xf32, #tpu.memory_space<smem>>
    %21 = vector.broadcast %20 : f32 to vector<1x256xf32>
    %22 = arith.mulf %21, %0 : vector<1x256xf32>
    %c1_9 = arith.constant 1 : index
    %c1_10 = arith.constant 1 : index
    %23 = memref.load %arg2[%c1_9, %c1_10] : memref<2x3xf32, #tpu.memory_space<smem>>
    %24 = vector.broadcast %23 : f32 to vector<1x256xf32>
    %25 = arith.mulf %24, %1 : vector<1x256xf32>
    %26 = arith.addf %22, %25 : vector<1x256xf32>
    %c1_11 = arith.constant 1 : index
    %27 = memref.load %arg3[%c1_11] : memref<3xf32, #tpu.memory_space<smem>>
    %28 = vector.broadcast %27 : f32 to vector<1x256xf32>
    %29 = arith.addf %26, %28 : vector<1x256xf32>
    %30 = math.tanh %29 : vector<1x256xf32>
    %31 = arith.select %7, %29, %30 : vector<1x256xi1>, vector<1x256xf32>
    %c0_12 = arith.constant 0 : index
    %c2 = arith.constant 2 : index
    %32 = memref.load %arg2[%c0_12, %c2] : memref<2x3xf32, #tpu.memory_space<smem>>
    %33 = vector.broadcast %32 : f32 to vector<1x256xf32>
    %34 = arith.mulf %33, %0 : vector<1x256xf32>
    %c1_13 = arith.constant 1 : index
    %c2_14 = arith.constant 2 : index
    %35 = memref.load %arg2[%c1_13, %c2_14] : memref<2x3xf32, #tpu.memory_space<smem>>
    %36 = vector.broadcast %35 : f32 to vector<1x256xf32>
    %37 = arith.mulf %36, %1 : vector<1x256xf32>
    %38 = arith.addf %34, %37 : vector<1x256xf32>
    %c2_15 = arith.constant 2 : index
    %39 = memref.load %arg3[%c2_15] : memref<3xf32, #tpu.memory_space<smem>>
    %40 = vector.broadcast %39 : f32 to vector<1x256xf32>
    %41 = arith.addf %38, %40 : vector<1x256xf32>
    %42 = math.tanh %41 : vector<1x256xf32>
    %43 = arith.select %7, %41, %42 : vector<1x256xi1>, vector<1x256xf32>
    %c0_16 = arith.constant 0 : index
    %c0_17 = arith.constant 0 : index
    %44 = memref.load %arg4[%c0_16, %c0_17] : memref<3x4xf32, #tpu.memory_space<smem>>
    %45 = vector.broadcast %44 : f32 to vector<1x256xf32>
    %46 = arith.mulf %19, %45 : vector<1x256xf32>
    %c1_18 = arith.constant 1 : index
    %c0_19 = arith.constant 0 : index
    %47 = memref.load %arg4[%c1_18, %c0_19] : memref<3x4xf32, #tpu.memory_space<smem>>
    %48 = vector.broadcast %47 : f32 to vector<1x256xf32>
    %49 = arith.mulf %31, %48 : vector<1x256xf32>
    %50 = arith.addf %46, %49 : vector<1x256xf32>
    %c2_20 = arith.constant 2 : index
    %c0_21 = arith.constant 0 : index
    %51 = memref.load %arg4[%c2_20, %c0_21] : memref<3x4xf32, #tpu.memory_space<smem>>
    %52 = vector.broadcast %51 : f32 to vector<1x256xf32>
    %53 = arith.mulf %43, %52 : vector<1x256xf32>
    %54 = arith.addf %50, %53 : vector<1x256xf32>
    %c0_22 = arith.constant 0 : index
    %55 = memref.load %arg5[%c0_22] : memref<4xf32, #tpu.memory_space<smem>>
    %56 = vector.broadcast %55 : f32 to vector<1x256xf32>
    %57 = arith.addf %54, %56 : vector<1x256xf32>
    %c0_23 = arith.constant 0 : index
    %c1_24 = arith.constant 1 : index
    %58 = memref.load %arg4[%c0_23, %c1_24] : memref<3x4xf32, #tpu.memory_space<smem>>
    %59 = vector.broadcast %58 : f32 to vector<1x256xf32>
    %60 = arith.mulf %19, %59 : vector<1x256xf32>
    %c1_25 = arith.constant 1 : index
    %c1_26 = arith.constant 1 : index
    %61 = memref.load %arg4[%c1_25, %c1_26] : memref<3x4xf32, #tpu.memory_space<smem>>
    %62 = vector.broadcast %61 : f32 to vector<1x256xf32>
    %63 = arith.mulf %31, %62 : vector<1x256xf32>
    %64 = arith.addf %60, %63 : vector<1x256xf32>
    %c2_27 = arith.constant 2 : index
    %c1_28 = arith.constant 1 : index
    %65 = memref.load %arg4[%c2_27, %c1_28] : memref<3x4xf32, #tpu.memory_space<smem>>
    %66 = vector.broadcast %65 : f32 to vector<1x256xf32>
    %67 = arith.mulf %43, %66 : vector<1x256xf32>
    %68 = arith.addf %64, %67 : vector<1x256xf32>
    %c1_29 = arith.constant 1 : index
    %69 = memref.load %arg5[%c1_29] : memref<4xf32, #tpu.memory_space<smem>>
    %70 = vector.broadcast %69 : f32 to vector<1x256xf32>
    %71 = arith.addf %68, %70 : vector<1x256xf32>
    %c0_30 = arith.constant 0 : index
    %c2_31 = arith.constant 2 : index
    %72 = memref.load %arg4[%c0_30, %c2_31] : memref<3x4xf32, #tpu.memory_space<smem>>
    %73 = vector.broadcast %72 : f32 to vector<1x256xf32>
    %74 = arith.mulf %19, %73 : vector<1x256xf32>
    %c1_32 = arith.constant 1 : index
    %c2_33 = arith.constant 2 : index
    %75 = memref.load %arg4[%c1_32, %c2_33] : memref<3x4xf32, #tpu.memory_space<smem>>
    %76 = vector.broadcast %75 : f32 to vector<1x256xf32>
    %77 = arith.mulf %31, %76 : vector<1x256xf32>
    %78 = arith.addf %74, %77 : vector<1x256xf32>
    %c2_34 = arith.constant 2 : index
    %c2_35 = arith.constant 2 : index
    %79 = memref.load %arg4[%c2_34, %c2_35] : memref<3x4xf32, #tpu.memory_space<smem>>
    %80 = vector.broadcast %79 : f32 to vector<1x256xf32>
    %81 = arith.mulf %43, %80 : vector<1x256xf32>
    %82 = arith.addf %78, %81 : vector<1x256xf32>
    %c2_36 = arith.constant 2 : index
    %83 = memref.load %arg5[%c2_36] : memref<4xf32, #tpu.memory_space<smem>>
    %84 = vector.broadcast %83 : f32 to vector<1x256xf32>
    %85 = arith.addf %82, %84 : vector<1x256xf32>
    %c0_37 = arith.constant 0 : index
    %c3 = arith.constant 3 : index
    %86 = memref.load %arg4[%c0_37, %c3] : memref<3x4xf32, #tpu.memory_space<smem>>
    %87 = vector.broadcast %86 : f32 to vector<1x256xf32>
    %88 = arith.mulf %19, %87 : vector<1x256xf32>
    %c1_38 = arith.constant 1 : index
    %c3_39 = arith.constant 3 : index
    %89 = memref.load %arg4[%c1_38, %c3_39] : memref<3x4xf32, #tpu.memory_space<smem>>
    %90 = vector.broadcast %89 : f32 to vector<1x256xf32>
    %91 = arith.mulf %31, %90 : vector<1x256xf32>
    %92 = arith.addf %88, %91 : vector<1x256xf32>
    %c2_40 = arith.constant 2 : index
    %c3_41 = arith.constant 3 : index
    %93 = memref.load %arg4[%c2_40, %c3_41] : memref<3x4xf32, #tpu.memory_space<smem>>
    %94 = vector.broadcast %93 : f32 to vector<1x256xf32>
    %95 = arith.mulf %43, %94 : vector<1x256xf32>
    %96 = arith.addf %92, %95 : vector<1x256xf32>
    %c3_42 = arith.constant 3 : index
    %97 = memref.load %arg5[%c3_42] : memref<4xf32, #tpu.memory_space<smem>>
    %98 = vector.broadcast %97 : f32 to vector<1x256xf32>
    %99 = arith.addf %96, %98 : vector<1x256xf32>
    %100 = tpu.concatenate %57, %71, %85, %99 in 0 : vector<1x256xf32>, vector<1x256xf32>, vector<1x256xf32>, vector<1x256xf32> -> vector<4x256xf32>
    %c0_43 = arith.constant 0 : index
    %c0_44 = arith.constant 0 : index
    %101 = vector.load %arg6[%c0_43, %c0_44] : memref<4x256xf32, #tpu.memory_space<vmem>>, vector<4x256xf32>
    tpu.vector_store %arg6[%c0_43, %c0_44], %100 {strides = array<i32>} : memref<4x256xf32, #tpu.memory_space<vmem>>, vector<4x256xf32>,
    return
  }
  func.func @transform_0(%arg0: i32) -> (i32, i32) {
    %c0_i32 = arith.constant 0 : i32
    %c0_i32_0 = arith.constant 0 : i32
    return %c0_i32, %arg0 : i32, i32
  }
  func.func @transform_1(%arg0: i32) -> (i32, i32) {
    %c0_i32 = arith.constant 0 : i32
    %c0_i32_0 = arith.constant 0 : i32
    %c0_i32_1 = arith.constant 0 : i32
    return %c0_i32, %c0_i32_0 : i32, i32
  }
  func.func @transform_2(%arg0: i32) -> i32 {
    %c0_i32 = arith.constant 0 : i32
    %c0_i32_0 = arith.constant 0 : i32
    return %c0_i32 : i32
  }
  func.func @transform_3(%arg0: i32) -> (i32, i32) {
    %c0_i32 = arith.constant 0 : i32
    %c0_i32_0 = arith.constant 0 : i32
    %c0_i32_1 = arith.constant 0 : i32
    return %c0_i32, %c0_i32_0 : i32, i32
  }
  func.func @transform_4(%arg0: i32) -> i32 {
    %c0_i32 = arith.constant 0 : i32
    %c0_i32_0 = arith.constant 0 : i32
    return %c0_i32 : i32
  }
  func.func @transform_5(%arg0: i32) -> (i32, i32) {
    %c0_i32 = arith.constant 0 : i32
    %c0_i32_0 = arith.constant 0 : i32
    return %c0_i32, %arg0 : i32, i32
  }
}

</mosaic_0001>

<bundles_post_ra>
// kernel: tpu_custom_call.1
= control target key start
LH: loop header
LB: loop body
LE: loop exit
PB: predicated region body
PF: predicated region fallthrough
CT: control target
= control target key end

     0   :  { %s1295_s0 = inlined_call_operand.hbm [shape: f32[2,1024], index: 0, kind: input, shape index: {}]   ;;  %s1296_s1 = inlined_call_operand.vmem [shape: f32[2,3], index: 1, kind: input, shape index: {}]   ;;  %s1297_s2 = inlined_call_operand.vmem [shape: f32[3], index: 2, kind: input, shape index: {}]   ;;  %s1298_s3 = inlined_call_operand.vmem [shape: f32[3,4], index: 3, kind: input, shape index: {}]   ;;  %s1299_s4 = inlined_call_operand.vmem [shape: f32[4], index: 4, kind: input, shape index: {}]   ;;  %s1300_s5 = inlined_call_operand.hbm [shape: f32[4,1024], index: 5, kind: output, shape index: {}]  }
   0x1   :  { %1304 = sst [smem:[#allocation18_spill]] %s1295_s0 }
   0x2   :  { %10 = vsyncpa [#allocation3], 0 }
   0x3   :  { %12 = vsyncpa [#allocation3 + $0x1], 0 }
   0x4   :  { %13 = vsyncpa [#allocation5], 0 }
   0x5   :  { %14 = vsyncpa [#allocation8], 0 }
   0x6   :  { %15 = vsyncpa [#allocation11], 0 }
   0x7   :  { %16 = vsyncpa [#allocation4], 0 }
   0x8   :  { %18 = vsyncpa [#allocation4 + $0x1], 0  ;;  %s996_s18 = smov 0   ;;  %s998_s19 = smov 0  }
   0x9   :  { %s1000_s20 = smov 0   ;;  %s1002_s21 = smov 0  }
   0xa LB: > { %s189_s24 = sshll.u32 %s1297_s2, 4  ;;  %s1020_s25 = sadd.s32 4294967295, %s958_s21   ;;  %s958_s21 = sphi %s1002_s21, %s1326_s21   ;;  %s954_s20 = sphi %s1000_s20, %s1325_s20   ;;  %s950_s19 = sphi %s998_s19, %s1324_s19   ;;  %s946_s18 = sphi %s996_s18, %s1323_s18   ;;  %s190_s24 = int_to_ptr.vmem [resolvable:$true] %s189_s24 }
   0xb   : > { %p651_p0 = scmp.ge.s32.totalorder %s958_s21, 1  ;;  %p1301_p1 = scmp.eq.s32.totalorder %s1020_s25, 0 }
   0xc   : > { %p165_p2 = scmp.lt.s32.totalorder %s958_s21, 5  ;;  %s178_s29 = sshll.u32 %s1296_s1, 4  ;;  %s179_s29 = int_to_ptr.vmem [resolvable:$true] %s178_s29 }
   0xd   : > { %s200_s7 = sshll.u32 %s1298_s3, 4  ;;  %s211_s11 = sshll.u32 %s1299_s4, 4  ;;  %s1043_s7 = int_to_ptr.vmem [resolvable:$true] %s200_s7  ;;  %s1048_s11 = int_to_ptr.vmem [resolvable:$true] %s211_s11 }
   0xe   : > { %p1025_p3 = pnand %p651_p0, %p165_p2  ;;  %s790_s12 = scalar_lea.vmem %s190_s24, 16 }
   0xf   : > { %p791_p6 = scmp.ne.s32.totalorder %s190_s24, %s790_s12  ;;  %p798_p10 = scmp.lt.s32.totalorder %s190_s24, %s190_s24 }
  0x10   : > { %s1305_s26 = scalar_select %p1025_p3, 1, 0 }
  0x11   : > { %p717_p4 = pneg %p1025_p3  ;;  %p799_p11 = scmp.lt.s32.totalorder %s790_s12, %s790_s12 }
  0x13   : > { %p1039_p5 = pnand %p717_p4, %p1301_p1  ;;  %p800_p12 = por %p799_p11, %p798_p10 }
  0x15   : > { %p792_p7 = pneg %p1039_p5 }
  0x17   : > { %p793_p8 = pnand %p792_p7, %p791_p6 }
  0x19   : > { %p794_p9 = pneg %p793_p8 }
  0x1b   : > { %p801_p13 = pnand %p800_p12, %p794_p9 }
  0x1d   : > { %804 = shalt.err (!%p801_p13)
}
  0x1e   : > { %s960_s13 = smov [#allocation7]   ;;  %s805_s14 = scalar_lea.vmem %s179_s29, 32 }
  0x1f   : > { %723 = dma.vmem_to_smem (!%p1039_p5), %s190_s24, 16, %s960_s13, [#allocation8]  }
  0x20   : > { %p806_p0 = scmp.ne.s32.totalorder %s179_s29, %s805_s14  ;;  %p813_p1 = scmp.lt.s32.totalorder %s179_s29, %s179_s29 }
  0x21   : > { %p814_p3 = scmp.lt.s32.totalorder %s805_s14, %s805_s14 }
  0x22   : > { %p808_p2 = pnand %p806_p0, %p792_p7 }
  0x23   : > { %p815_p6 = por %p814_p3, %p813_p1 }
  0x24   : > { %p809_p4 = pneg %p808_p2 }
  0x26   : > { %p816_p8 = pnand %p815_p6, %p809_p4 }
  0x28   : > { %819 = shalt.err (!%p816_p8)
}
  0x29   : > { %s961_s15 = smov [#allocation6]   ;;  %s820_s16 = scalar_lea.vmem %s1043_s7, 64 }
  0x2a   : > { %720 = dma.vmem_to_smem (!%p1039_p5), %s179_s29, 32, %s961_s15, [#allocation5]  }
  0x2b   : > { %p821_p9 = scmp.ne.s32.totalorder %s1043_s7, %s820_s16  ;;  %p828_p12 = scmp.lt.s32.totalorder %s1043_s7, %s1043_s7 }
  0x2c   : > { %p829_p13 = scmp.lt.s32.totalorder %s820_s16, %s820_s16 }
  0x2d   : > { %p823_p10 = pnand %p821_p9, %p792_p7 }
  0x2e   : > { %p830_p1 = por %p829_p13, %p828_p12 }
  0x2f   : > { %p824_p11 = pneg %p823_p10 }
  0x31   : > { %p831_p3 = pnand %p830_p1, %p824_p11 }
  0x33   : > { %834 = shalt.err (!%p831_p3)
}
  0x34   : > { %s962_s17 = smov [#allocation9]   ;;  %s835_s22 = scalar_lea.vmem %s1048_s11, 16 }
  0x35   : > { %726 = dma.vmem_to_smem (!%p1039_p5), %s1043_s7, 64, %s962_s17, [#allocation8]  }
  0x36   : > { %p836_p0 = scmp.ne.s32.totalorder %s1048_s11, %s835_s22  ;;  %p843_p6 = scmp.lt.s32.totalorder %s1048_s11, %s1048_s11 }
  0x37   : > { %p844_p8 = scmp.lt.s32.totalorder %s835_s22, %s835_s22 }
  0x38   : > { %p838_p2 = pnand %p836_p0, %p792_p7 }
  0x39   : > { %p845_p9 = por %p844_p8, %p843_p6 }
  0x3a   : > { %p839_p4 = pneg %p838_p2 }
  0x3c   : > { %p846_p10 = pnand %p845_p9, %p839_p4 }
  0x3e   : > { %849 = shalt.err (!%p846_p10)
}
  0x3f   : > { %s963_s23 = smov [#allocation10]   ;;  %s650_s24 = sadd.s32 4294967294, %s958_s21  }
  0x40   : > { %729 = dma.vmem_to_smem (!%p1039_p5), %s1048_s11, 16, %s963_s23, [#allocation11]  }
  0x41   : > { %s1084_s27 = sadd.s32 1, %s958_s21   ;;  %s31_s29 = sadd.s32 1, %s954_s20 }
  0x42   : > { %s28_s28 = ssub.s32 %s958_s21, %s1084_s27  ;;  %p38_p11 = scmp.ne.s32.totalorder %s954_s20, %s950_s19 }
  0x43   : > { %p29_p7 = scmp.eq.s32.totalorder %s28_s28, 0  ;;  %p39_p12 = scmp.eq.s32.totalorder %s958_s21, 0 }
  0x44   : > { %p44_p13 = scmp.ne.s32.totalorder %s950_s19, %s946_s18  ;;  %p1308_p3 = scmp.eq.s32.totalorder %s1020_s25, 0 }
  0x45   : > { %s1095_s30 = scalar_select %p29_p7, %s954_s20, %s31_s29  }
  0x46   : > { %p1097_p1 = por %p39_p12, %p38_p11  ;;  %p1103_p5 = por %p1308_p3, %p44_p13 }
  0x47   : > { %p152_p0 = scmp.eq.s32.totalorder %s1020_s25, 3  ;;  %p158_p2 = scmp.eq.s32.totalorder %s650_s24, 3 }
  0x48   : > { %p742_p4 = scmp.lt.s32.totalorder %s958_s21, 4  ;;  %s222_s8 = sand.u32 1, %s954_s20  }
  0x49   : > { %p1110_p6 = por %p152_p0, %p38_p11  ;;  %p1114_p8 = por %p158_p2, %p44_p13 }
  0x4a   : > { %s657_s11 = sshll.u32 %s222_s8, 2  ;;  %s695_s12 = sshll.u32 %s958_s21, 6 }
  0x4b   : > { %s1310_s9 = scalar_select %p1110_p6, 1, 0 }
  0x4c   : > { %s1311_s10 = scalar_select %p1114_p8, 1, 0 }
  0x4d   : > { %s1312_s0 = sld [smem:[#allocation18_spill]]  ;;  %s226_s16 = scalar_lea.vmem [#allocation2], %s657_s11 }
  0x4e   : > { %s234_s17 = sshll.u32 %s226_s16, 4  ;;  %p1128_p9 = pnand %p742_p4, %p1097_p1  ;;  %s1124_s17 = int_to_ptr.vmem [resolvable:$true] %s234_s17 }
  0x4f   : > { %s223_s23 = scalar_lea.sflag [#allocation3], %s222_s8 }
  0x50   : > { %p852_p7 = pneg %p1128_p9 }
  0x53   : > { %s1122_s15 = scalar_lea.hbm %s1312_s0, %s695_s12  ;;  %s855_s11 = scalar_lea.hbm %s1312_s0, 256 }
  0x54   : > { %s850_s24 = scalar_lea.hbm %s1122_s15, 64  ;;  %p856_p13 = scmp.lt.u32.totalorder %s1122_s15, %s1312_s0 }
  0x55   : > { %p851_p10 = scmp.ne.s32.totalorder %s1122_s15, %s850_s24  ;;  %p857_p1 = scmp.lt.u32.totalorder %s855_s11, %s850_s24 }
  0x56   : > { %p859_p0 = scmp.lt.u32.totalorder %s850_s24, %s1122_s15 }
  0x57   : > { %p853_p11 = pnand %p852_p7, %p851_p10  ;;  %p858_p3 = por %p857_p1, %p856_p13 }
  0x59   : > { %p854_p12 = pneg %p853_p11  ;;  %p860_p2 = por %p859_p0, %p858_p3 }
  0x5b   : > { %p861_p4 = pnand %p860_p2, %p854_p12 }
  0x5d   : > { %864 = shalt.err (!%p861_p4)
}
  0x5e   : > { %s865_s8 = scalar_lea.vmem %s1124_s17, 64  ;;  %s964_s13 = smov [#allocation2]  }
  0x5f   : > { %p866_p10 = scmp.ne.s32.totalorder %s1124_s17, %s865_s8  ;;  %s870_s14 = sshll.u32 %s964_s13, 4  ;;  %s871_s14 = int_to_ptr.vmem [resolvable:$false] %s870_s14 }
  0x60   : > { %s872_s16 = scalar_lea.vmem %s871_s14, 128  ;;  %p873_p6 = scmp.lt.s32.totalorder %s1124_s17, %s871_s14 }
  0x61   : > { %p868_p11 = pnand %p866_p10, %p852_p7  ;;  %p874_p13 = scmp.lt.s32.totalorder %s872_s16, %s865_s8 }
  0x63   : > { %p869_p8 = pneg %p868_p11  ;;  %p875_p1 = por %p874_p13, %p873_p6 }
  0x65   : > { %p876_p3 = pnand %p875_p1, %p869_p8 }
  0x67   : > { %879 = shalt.err (!%p876_p3)
}
  0x68   : > { %733 = dma.hbm_to_vmem [thread:$0]  (!%p1128_p9), %s1122_s15, 64, %s1124_s17, %s223_s23  }
  0x69   : > { %p1314_p12 = scmp.ne.s32.totalorder %s1305_s26, 0 }
  0x6a   : > { %s1160_s24 = sand.u32 (!%p1314_p12), 1, %s950_s19  }
  0x6b   : > { %243 = sbr.rel (%p1314_p12) target bundleno = 191 (0xbf), region = 40  ;;  %s661_s28 = sshll.u32 (!%p1314_p12), %s1160_s24, 2 }
  0x6c   : > { %s246_s29 = scalar_lea.sflag (!%p1314_p12), [#allocation3], %s1160_s24  ;;  %s249_s11 = scalar_lea.vmem (!%p1314_p12), [#allocation2], %s661_s28 }
  0x72   : > { %925 = dma.done.wait (%p1103_p5), %s246_s29, 64  }
  0x73   : > { %927 = vsyncadd (%p1103_p5), %s246_s29, 4294967232  ;;  %p1315_p6 = scmp.eq.s32.totalorder %s1020_s25, 0 }
  0x75   : > { %929 = dma.done.wait (%p1315_p6), [#allocation5], 32   ;;  %p1316_p8 = pmov %p1315_p6 }
  0x76   : > { %p1317_p9 = pmov %p1315_p6 }
  0x77   : > { %931 = vsyncadd (%p1316_p8), [#allocation5], 4294967264 }
  0x78   : > { %933 = dma.done.wait (%p1317_p9), [#allocation8], 80   ;;  %p1318_p7 = pmov %p1315_p6 }
  0x79   : > { %p1319_p0 = pmov %p1315_p6 }
  0x7a   : > { %935 = vsyncadd (%p1318_p7), [#allocation8], 4294967216 }
  0x7b   : > { %937 = dma.done.wait (%p1319_p0), [#allocation11], 16   ;;  %p1320_p2 = pmov %p1319_p0 }
  0x7d   : > { %939 = vsyncadd (%p1320_p2), [#allocation11], 4294967280 }
  0x7e   : > { %270 = sfence }
  0x7f   : > { %s307_s26 = sld [smem:[#allocation6]]  ;;  %s670_s17 = sld [smem:[#allocation6 + $0x1]]  ;;  %v295_v0 = vld [vmem:[%s249_s11] ss:$2 sm:$0x3]  ;;  %v298_v1 = vlaneseq  ;;  %vm510_vm2 = vcmask 1040384  }
  0x80   : > { %s669_s7 = sld [smem:[#allocation6 + $0x80]]  ;;  %s671_s22 = sld [smem:[#allocation6 + $0x81]]  ;;  %v667_v2 = vld [vmem:[%s249_s11 + $0x1] ss:$2 sm:$0x3]  ;;  %vm513_vm3 = vcmask 1041408  }
  0x81   : > { %s314_s15 = sld [smem:[#allocation7]]  ;;  %s1180_s23 = sld [smem:[#allocation7 + $0x1]]  ;;  %v299_v6 = vand.u32 127, %v298_v1  ;;  %v320_v26 = vshrl.u32 %v298_v1, 7  ;;  %vm516_vm4 = vcmask 1042432  }
  0x82   : > { %s673_s6 = sld [smem:[#allocation6 + $0x2]]  ;;  %s668_s13 = sshll.u32 %s1020_s25, 8 }
  0x83   : > { %s674_s12 = sld [smem:[#allocation6 + $0x82]]  ;;  %v300_v20 = vadd.s32 128, %v299_v6  ;;  %s1187_s14 = sld [smem:[#allocation9]]  ;;  %v302_v23 = vstv %s668_s13  ;;  %v321_v30 = vsub.s32 0, %v320_v26  ;;  %v325_v31 = vsub.s32 1, %v320_v26 }
  0x84   : > { %s1182_s8 = sld [smem:[#allocation7 + $0x2]]  ;;  %s1189_s16 = sld [smem:[#allocation9 + $0x80]]  ;;  %v303_v28 = vadd.s32 %v302_v23, %v299_v6 }
  0x85   : > { %v308_v3 = vstv %s307_s26  ;;  %v343_v8 = vstv %s670_s17  ;;  %s1191_s28 = sld [smem:[#allocation9 + $0x100]]  ;;  %s1195_s11 = sld [smem:[#allocation9 + $0x1]]  ;;  %v304_v29 = vadd.s32 %v302_v23, %v300_v20 }
  0x86   : > { %v309_v4 = vmul.f32 %v308_v3, %v295_v0  ;;  %v311_v5 = vstv %s669_s7  ;;  %v346_v9 = vstv %s671_s22  ;;  %v344_v11 = vmul.f32 %v343_v8, %v295_v0  ;;  %s1193_s29 = sld [smem:[#allocation10]]  ;;  %s1197_s26 = sld [smem:[#allocation9 + $0x81]] }
  0x87   : > { %v312_v7 = vmul.f32 %v667_v2, %v311_v5  ;;  %v315_v10 = vstv %s314_s15  ;;  %v347_v12 = vmul.f32 %v667_v2, %v346_v9  ;;  %v350_v14 = vstv %s1180_s23  ;;  %s1199_s7 = sld [smem:[#allocation9 + $0x101]]  ;;  %s1203_s17 = sld [smem:[#allocation9 + $0x2]] }
  0x88   : > { %v378_v15 = vstv %s673_s6  ;;  %s1201_s15 = sld [smem:[#allocation10 + $0x1]]  ;;  %s1205_s22 = sld [smem:[#allocation9 + $0x82]]  ;;  %vm305_vm0 = vcmp.eq.s32.totalorder %v303_v28, 0  ;;  %vm306_vm1 = vcmp.eq.s32.totalorder %v304_v29, 0 }
  0x89   : > { %v313_v13 = vadd.f32 %v312_v7, %v309_v4  ;;  %v381_v16 = vstv %s674_s12  ;;  %v348_v17 = vadd.f32 %v347_v12, %v344_v11  ;;  %v379_v18 = vmul.f32 %v378_v15, %v295_v0  ;;  %s1207_s23 = sld [smem:[#allocation9 + $0x102]]  ;;  %s1211_s12 = sld [smem:[#allocation9 + $0x3]] }
  0x8a   : > { %v382_v19 = vmul.f32 %v667_v2, %v381_v16  ;;  %v385_v22 = vstv %s1182_s8  ;;  %s1209_s6 = sld [smem:[#allocation10 + $0x2]]  ;;  %s1213_s8 = sld [smem:[#allocation9 + $0x83]]  ;;  %v413_v32 = vstv %s1187_s14  ;;  %v417_v33 = vstv %s1189_s16 }
  0x8b   : > { %v316_v21 = vadd.f32 %v315_v10, %v313_v13  ;;  %v351_v24 = vadd.f32 %v350_v14, %v348_v17  ;;  %s1215_s13 = sld [smem:[#allocation9 + $0x103]]  ;;  %v423_v34 = vstv %s1191_s28  ;;  %v433_v38 = vstv %s1195_s11  ;;  %s666_s14 = sshll.u32 %s1160_s24, 3 }
  0x8c   : > { %v383_v25 = vadd.f32 %v382_v19, %v379_v18  ;;  %s1217_s0 = sld [smem:[#allocation10 + $0x3]]  ;;  %v429_v35 = vstv %s1193_s29  ;;  %v437_v39 = vstv %s1197_s26  ;;  %s696_s16 = sshll.u32 %s1020_s25, 7 }
  0x8d   : > { %784 = vtanh.f32 %v316_v21  ;;  %v322_v36 = vrot.slane %v316_v21, %v321_v30  ;;  %v326_v37 = vrot.slane %v316_v21, %v325_v31  ;;  %v357_v40 = vrot.slane %v351_v24, %v321_v30  ;;  %s292_s28 = scalar_lea.vmem [#allocation12], %s666_s14  ;;  %p1321_p4 = scmp.ne.s32.totalorder %s1310_s9, 0 }
  0x8e   : > { %786 = vtanh.f32 %v351_v24  ;;  %v386_v27 = vadd.f32 %v385_v22, %v383_v25  ;;  %v361_v41 = vrot.slane %v351_v24, %v325_v31  ;;  %v443_v42 = vstv %s1199_s7  ;;  %s539_s29 = sshll.u32 %s292_s28, 4  ;;  %s1252_s7 = scalar_lea.hbm %s1300_s5, %s696_s16  ;;  %s1254_s29 = int_to_ptr.vmem [resolvable:$true] %s539_s29 }
  0x8f   : > { %v449_v43 = vstv %s1201_s15  ;;  %v453_v47 = vstv %s1203_s17  ;;  %v457_v48 = vstv %s1205_s22  ;;  %v463_v52 = vstv %s1207_s23  ;;  %s880_s15 = scalar_lea.vmem %s1254_s29, 128  ;;  %s965_s25 = smov [#allocation12]  }
  0x90   : > { %788 = vtanh.f32 %v386_v27  ;;  %v392_v45 = vrot.slane %v386_v27, %v321_v30  ;;  %v396_v46 = vrot.slane %v386_v27, %v325_v31  ;;  %v469_v53 = vstv %s1209_s6  ;;  %p881_p5 = scmp.ne.s32.totalorder %s1254_s29, %s880_s15  ;;  %s884_s17 = sshll.u32 %s965_s25, 4  ;;  %s885_s17 = int_to_ptr.vmem [resolvable:$false] %s884_s17 }
  0x91   : > { %v473_v56 = vstv %s1211_s12  ;;  %v477_v57 = vstv %s1213_s8  ;;  %v483_v61 = vstv %s1215_s13  ;;  %s886_s22 = scalar_lea.vmem %s885_s17, 256  ;;  %p887_p13 = scmp.lt.s32.totalorder %s1254_s29, %s885_s17 }
  0x92   : > { %v489_v62 = vstv %s1217_s0  ;;  %s525_s0 = scalar_lea.sflag [#allocation4], %s1160_s24  ;;  %p882_p10 = pnand %p881_p5, %p1321_p4 }
  0x93   : > { %p888_p1 = scmp.lt.s32.totalorder %s886_s22, %s880_s15 }
  0x94   : > { %p883_p11 = pneg %p882_p10 }
  0x95   : > { %p889_p3 = por %p888_p1, %p887_p13 }
  0x97   : > { %v785_v44 = vpop.eup %784  ;;  %p890_p12 = pnand %p889_p3, %p883_p11 }
  0x98   : > { %v787_v49 = vpop.eup %786  ;;  %v333_v50 = vrot.slane %v785_v44, %v321_v30  ;;  %v337_v51 = vrot.slane %v785_v44, %v325_v31 }
  0x99   : > { %v368_v54 = vrot.slane %v787_v49, %v321_v30  ;;  %v372_v55 = vrot.slane %v787_v49, %v325_v31 }
  0x9a   : > { %v789_v58 = vpop.eup %788  ;;  %v340_v59 = vsel %vm305_vm0, %v322_v36, %v333_v50  ;;  %v341_v60 = vsel %vm306_vm1, %v326_v37, %v337_v51 }
  0x9b   : > { %v375_v63 = vsel %vm305_vm0, %v357_v40, %v368_v54  ;;  %v376_v0 = vsel %vm306_vm1, %v361_v41, %v372_v55  ;;  %v403_v1 = vrot.slane %v789_v58, %v321_v30  ;;  %v407_v2 = vrot.slane %v789_v58, %v325_v31 }
  0x9c   : > { %v414_v3 = vmul.f32 %v413_v32, %v340_v59  ;;  %v415_v4 = vmul.f32 %v413_v32, %v341_v60  ;;  %v418_v5 = vmul.f32 %v417_v33, %v375_v63  ;;  %v419_v6 = vmul.f32 %v417_v33, %v376_v0 }
  0x9d   : > { %v410_v7 = vsel %vm305_vm0, %v392_v45, %v403_v1  ;;  %v411_v8 = vsel %vm306_vm1, %v396_v46, %v407_v2  ;;  %v434_v9 = vmul.f32 %v433_v38, %v340_v59  ;;  %v435_v10 = vmul.f32 %v433_v38, %v341_v60 }
  0x9e   : > { %v420_v11 = vadd.f32 %v418_v5, %v414_v3  ;;  %v421_v12 = vadd.f32 %v419_v6, %v415_v4  ;;  %v424_v13 = vmul.f32 %v423_v34, %v410_v7  ;;  %v425_v14 = vmul.f32 %v423_v34, %v411_v8 }
  0x9f   : > { %v438_v15 = vmul.f32 %v437_v39, %v375_v63  ;;  %v439_v16 = vmul.f32 %v437_v39, %v376_v0  ;;  %v444_v17 = vmul.f32 %v443_v42, %v410_v7  ;;  %v445_v18 = vmul.f32 %v443_v42, %v411_v8 }
  0xa0   : > { %v426_v19 = vadd.f32 %v424_v13, %v420_v11  ;;  %v427_v20 = vadd.f32 %v425_v14, %v421_v12  ;;  %v454_v21 = vmul.f32 %v453_v47, %v340_v59  ;;  %v455_v22 = vmul.f32 %v453_v47, %v341_v60 }
  0xa1   : > { %v440_v23 = vadd.f32 %v438_v15, %v434_v9  ;;  %v441_v24 = vadd.f32 %v439_v16, %v435_v10  ;;  %v458_v25 = vmul.f32 %v457_v48, %v375_v63  ;;  %v459_v26 = vmul.f32 %v457_v48, %v376_v0 }
  0xa2   : > { %v430_v27 = vadd.f32 %v429_v35, %v426_v19  ;;  %v431_v28 = vadd.f32 %v429_v35, %v427_v20  ;;  %v464_v29 = vmul.f32 %v463_v52, %v410_v7  ;;  %v465_v30 = vmul.f32 %v463_v52, %v411_v8 }
  0xa3   : > { %v446_v31 = vadd.f32 %v444_v17, %v440_v23  ;;  %v447_v32 = vadd.f32 %v445_v18, %v441_v24  ;;  %v460_v33 = vadd.f32 %v458_v25, %v454_v21  ;;  %v461_v34 = vadd.f32 %v459_v26, %v455_v22 }
  0xa4   : > { %v474_v36 = vmul.f32 %v473_v56, %v340_v59  ;;  %v475_v37 = vmul.f32 %v473_v56, %v341_v60  ;;  %v478_v38 = vmul.f32 %v477_v57, %v375_v63  ;;  %v479_v39 = vmul.f32 %v477_v57, %v376_v0 }
  0xa5   : > { %v450_v40 = vadd.f32 %v449_v43, %v446_v31  ;;  %v451_v41 = vadd.f32 %v449_v43, %v447_v32  ;;  %v466_v42 = vadd.f32 %v464_v29, %v460_v33  ;;  %v467_v44 = vadd.f32 %v465_v30, %v461_v34 }
  0xa6   : > { %v480_v45 = vadd.f32 %v478_v38, %v474_v36  ;;  %v481_v46 = vadd.f32 %v479_v39, %v475_v37  ;;  %v484_v35 = vmul.f32 %v483_v61, %v410_v7  ;;  %v485_v47 = vmul.f32 %v483_v61, %v411_v8 }
  0xa7   : > { %v470_v48 = vadd.f32 %v469_v53, %v466_v42  ;;  %v471_v49 = vadd.f32 %v469_v53, %v467_v44  ;;  %v494_v50 = vrot.slane %v450_v40, 7  ;;  %v495_v51 = vrot.slane %v451_v41, 7 }
  0xa8   : > { %v486_v52 = vadd.f32 %v484_v35, %v480_v45  ;;  %v487_v54 = vadd.f32 %v485_v47, %v481_v46 }
  0xa9   : > { %v500_v55 = vrot.slane %v470_v48, 6  ;;  %v501_v56 = vrot.slane %v471_v49, 6  ;;  %v511_v43 = vsel %vm510_vm2, %v430_v27, %v494_v50  ;;  %v512_v57 = vsel %vm510_vm2, %v431_v28, %v495_v51 }
  0xaa   : > { %v490_v58 = vadd.f32 %v489_v62, %v486_v52  ;;  %v491_v59 = vadd.f32 %v489_v62, %v487_v54 }
  0xab   : > { %v514_v60 = vsel %vm513_vm3, %v511_v43, %v500_v55  ;;  %v515_v61 = vsel %vm513_vm3, %v512_v57, %v501_v56 }
  0xac   : > { %v506_v53 = vrot.slane %v490_v58, 5  ;;  %v507_v63 = vrot.slane %v491_v59, 5 }
  0xae   : > { %v517_v0 = vsel %vm516_vm4, %v514_v60, %v506_v53  ;;  %v518_v1 = vsel %vm516_vm4, %v515_v61, %v507_v63 }
  0xaf   : > { %v521_v2 = vcombine.low %v517_v0, %v518_v1 }
  0xb1   : > { %523 = vst [vmem:[%s292_s28] sm:$0xff] %v521_v2 }
  0xb2   : > { %893 = shalt.err (!%p890_p12)
}
  0xb3   : > { %s894_s24 = scalar_lea.hbm %s1252_s7, 128  ;;  %s898_s12 = scalar_lea.hbm %s1300_s5, 512 }
  0xb4   : > { %p895_p6 = scmp.ne.s32.totalorder %s1252_s7, %s894_s24  ;;  %p899_p7 = scmp.lt.u32.totalorder %s1252_s7, %s1300_s5 }
  0xb5   : > { %p900_p0 = scmp.lt.u32.totalorder %s898_s12, %s894_s24  ;;  %p902_p5 = scmp.lt.u32.totalorder %s894_s24, %s1252_s7 }
  0xb6   : > { %p896_p8 = pnand %p895_p6, %p1321_p4 }
  0xb7   : > { %p901_p2 = por %p900_p0, %p899_p7 }
  0xb8   : > { %p897_p9 = pneg %p896_p8 }
  0xb9   : > { %p903_p10 = por %p902_p5, %p901_p2 }
  0xbb   : > { %p904_p11 = pnand %p903_p10, %p897_p9 }
  0xbd   : > { %907 = shalt.err (!%p904_p11)
}
  0xbe   : > { %715 = dma.vmem_to_hbm [thread:$0]  (%p1321_p4), %s1254_s29, 128, %s1252_s7, %s525_s0  }
  0xbf PF: > { %p747_p13 = scmp.ge.s32.totalorder %s958_s21, 2  ;;  %s551_s14 = sand.u32 1, %s946_s18  }
  0xc0   : > { %p1322_p1 = scmp.ne.s32.totalorder %s1311_s10, 0  ;;  %s552_s16 = scalar_lea.sflag [#allocation4], %s551_s14 }
  0xc2   : > { %p735_p3 = pnand %p747_p13, %p1322_p1 }
  0xc4   : > { %941 = dma.done.wait (!%p735_p3), %s552_s16, 128  }
  0xc5   : > { %943 = vsyncadd (!%p735_p3), %s552_s16, 4294967168  ;;  %p21_p12 = scmp.ge.s32.totalorder %s1084_s27, 6   ;;  %s1323_s18 = smov %s950_s19 }
  0xc6   : > { %s1324_s19 = smov %s954_s20  ;;  %s1325_s20 = smov %s1095_s30 }
  0xc7   : > { %s1326_s21 = smov %s1084_s27  ;;  %23 = sbr.rel (!%p21_p12) target bundleno = 10 (0xa), region = 103 }
  0xce   :  { %557 = vsyncpa [#allocation3], 1 }
  0xcf   :  { %559 = vsyncpa [#allocation3 + $0x1], 1 }
  0xd0   :  { %560 = vsyncpa [#allocation4], 1 }
  0xd1   :  { %562 = vsyncpa [#allocation4 + $0x1], 1 }
  0xd2   :  { %563 = vsyncpa [#allocation5], 1 }
  0xd3   :  { %565 = vsyncpa [#allocation5 + $0x1], 1 }
  0xd4   :  { %566 = vsyncpa [#allocation8], 1 }
  0xd5   :  { %567 = vsyncpa [#allocation11], 1 }

</bundles_post_ra>
